<compile_context>
chip_gen: v5e
topology: v5e:2x2
jax: 0.10.0
libtpu: 0.0.40
codegen_flags: <defaults>
</compile_context>

<pallas_src>
import jax
import jax.numpy as jnp
from jax.experimental import pallas as pl
from jax.experimental.pallas import tpu as pltpu


def spc_head_kernel(h_ref, w_ref, b_ref, o_ref, acc_ref):
    # h_ref:   [TB, TS, H]   hidden-state tile (streamed)
    # w_ref:   [H, 128]      fused projection (resident, padded to 128 lanes)
    # b_ref:   [1, 128]      fused bias        (resident, padded to 128 lanes)
    # o_ref:   [TB, 128]     padded logits
    # acc_ref: [TB, H] f32   running max over the sequence
    s = pl.program_id(1)

    @pl.when(s == 0)
    def _():
        acc_ref[...] = jnp.full_like(acc_ref, -jnp.inf)

    # Max over this sequence tile, then elementwise-maximum into the
    # accumulator (cheap VPU maxima; only a small sublane reduce per tile).
    tile_max = jnp.max(h_ref[...].astype(jnp.float32), axis=1)   # [TB, H]
    acc_ref[...] = jnp.maximum(acc_ref[...], tile_max)

    @pl.when(s == pl.num_programs(1) - 1)
    def _():
        logits = jnp.dot(acc_ref[...], w_ref[...],
                         preferred_element_type=jnp.float32) + b_ref[...]
        o_ref[...] = logits.astype(o_ref.dtype)


def _largest_tile(n, cap, align):
    """Largest t <= cap dividing n that is a multiple of `align` or equal to n."""
    if n <= cap:
        return n
    for t in range(min(cap, n), 0, -1):
        if n % t == 0 and (t % align == 0 or t == n):
            return t
    return n


def spc_head(hidden_states, w1, b1, w2, b2, *, tb_max=8, ts_max=128, n_pad=128):
    """hidden_states: [B, S, 768] -> logits [B, 2] f32.

    w1: [768, 256], b1: [256], w2: [256, 2], b2: [2]
    (Linear weights stored pre-transposed as [in, out]; y = x @ W + b.)
    """
    B, S, H = hidden_states.shape
    d_out = w2.shape[1]

    # Fold linear1 ∘ linear2 (no nonlinearity between them) into one projection.
    w_fused = jnp.dot(w1, w2, preferred_element_type=jnp.float32)        # [H, d_out]
    b_fused = jnp.dot(b1, w2, preferred_element_type=jnp.float32) + b2   # [d_out]

    # Zero-pad the projection to 128 output lanes for lane-dense stores.
    w_p = jnp.zeros((H, n_pad), jnp.float32).at[:, :d_out].set(w_fused)
    b_p = jnp.zeros((1, n_pad), jnp.float32).at[:, :d_out].set(b_fused)

    tb = _largest_tile(B, tb_max, 1)   # leading dim: no alignment constraint
    ts = _largest_tile(S, ts_max, 8)   # sublane dim: multiple of 8 (or full S)
    grid = (B // tb, S // ts)

    logits_padded = pl.pallas_call(
        spc_head_kernel,
        out_shape=jax.ShapeDtypeStruct((B, n_pad), jnp.float32),
        grid_spec=pltpu.PrefetchScalarGridSpec(
            num_scalar_prefetch=0,
            grid=grid,
            in_specs=[
                pl.BlockSpec((tb, ts, H), lambda b, s: (b, s, 0)),
                pl.BlockSpec((H, n_pad), lambda b, s: (0, 0)),   # resident
                pl.BlockSpec((1, n_pad), lambda b, s: (0, 0)),   # resident
            ],
            out_specs=pl.BlockSpec((tb, n_pad), lambda b, s: (b, 0)),
            scratch_shapes=[pltpu.VMEM((tb, H), jnp.float32)],
        ),
        compiler_params=pltpu.CompilerParams(
            dimension_semantics=("parallel", "arbitrary")),
    )(hidden_states, w_p, b_p)

    return logits_padded[:, :d_out]


def reference(hidden_states, w1, b1, w2, b2):
    pooled = jnp.max(hidden_states, axis=1)
    return (pooled @ w1 + b1) @ w2 + b2


if __name__ == "__main__":
    key = jax.random.PRNGKey(0)
    k_h, k_w1, k_b1, k_w2, k_b2 = jax.random.split(key, 5)

    B, S, H, D1, D2 = 2, 8, 768, 256, 2   # hidden=768 / 256 / 2 fixed by the module

    # Stand-in for BERT's last hidden states.
    hidden_states = jax.random.normal(k_h, (B, S, H), dtype=jnp.float32)

    # Deterministic parameter init (Linear weights stored as [in, out]).
    w1 = jax.random.normal(k_w1, (H, D1), dtype=jnp.float32) * 0.02
    b1 = jax.random.normal(k_b1, (D1,), dtype=jnp.float32) * 0.02
    w2 = jax.random.normal(k_w2, (D1, D2), dtype=jnp.float32) * 0.02
    b2 = jax.random.normal(k_b2, (D2,), dtype=jnp.float32) * 0.02

    out = jax.block_until_ready(spc_head(hidden_states, w1, b1, w2, b2))

    ref = reference(hidden_states, w1, b1, w2, b2)
    assert out.shape == (B, D2)
    assert jnp.allclose(out, ref, atol=1e-4, rtol=1e-4), \
        float(jnp.max(jnp.abs(out - ref)))

    print("KERNEL_OK")
</pallas_src>

<mosaic_0001>
module attributes {stable_mosaic.version = 11 : i64} {
  func.func @spc_head_kernel(%arg0: i32, %arg1: i32, %arg2: memref<2x8x768xf32, #tpu.memory_space<vmem>>, %arg3: memref<768x128xf32, #tpu.memory_space<vmem>>, %arg4: memref<1x128xf32, #tpu.memory_space<vmem>>, %arg5: memref<2x128xf32, #tpu.memory_space<vmem>>, %arg6: memref<2x768xf32, #tpu.memory_space<vmem>>) attributes {dimension_semantics = [#tpu.dimension_semantics<parallel>, #tpu.dimension_semantics<arbitrary>], iteration_bounds = array<i64: 1, 1>, scalar_prefetch = 0 : i64, scratch_operands = 1 : i64, tpu.core_type = #tpu.core_type<tc>, window_params = [{transform_indices = @transform_0, window_bounds = array<i64: 2, 8, 768>}, {pipeline_mode = #tpu.pipeline_mode<synchronous>, transform_indices = @transform_1, window_bounds = array<i64: 768, 128>}, {pipeline_mode = #tpu.pipeline_mode<synchronous>, transform_indices = @transform_2, window_bounds = array<i64: 1, 128>}, {transform_indices = @transform_3, window_bounds = array<i64: 2, 128>}]} {
    %c0_i32 = arith.constant 0 : i32
    %0 = arith.cmpi eq, %arg1, %c0_i32 : i32
    %1 = arith.extui %0 : i1 to i32
    %c0_i32_0 = arith.constant 0 : i32
    %2 = arith.cmpi ne, %1, %c0_i32_0 : i32
    scf.if %2 {
      %cst_9 = arith.constant 0xFF800000 : f32
      %11 = vector.broadcast %cst_9 : f32 to vector<2x768xf32>
      %c0_10 = arith.constant 0 : index
      %c0_11 = arith.constant 0 : index
      %12 = vector.load %arg6[%c0_10, %c0_11] : memref<2x768xf32, #tpu.memory_space<vmem>>, vector<2x768xf32>
      tpu.vector_store %arg6[%c0_10, %c0_11], %11 {strides = array<i32>} : memref<2x768xf32, #tpu.memory_space<vmem>>, vector<2x768xf32>,
    } else {
    }
    %c0 = arith.constant 0 : index
    %c0_1 = arith.constant 0 : index
    %c0_2 = arith.constant 0 : index
    %3 = vector.load %arg2[%c0, %c0_1, %c0_2] : memref<2x8x768xf32, #tpu.memory_space<vmem>>, vector<2x8x768xf32>
    %cst = arith.constant dense<0xFF800000> : vector<2x768xf32>
    %4 = vector.multi_reduction <maximumf>, %3, %cst [1] : vector<2x8x768xf32> to vector<2x768xf32>
    %c0_3 = arith.constant 0 : index
    %c0_4 = arith.constant 0 : index
    %5 = vector.load %arg6[%c0_3, %c0_4] : memref<2x768xf32, #tpu.memory_space<vmem>>, vector<2x768xf32>
    %6 = arith.maximumf %5, %4 : vector<2x768xf32>
    %c0_5 = arith.constant 0 : index
    %c0_6 = arith.constant 0 : index
    %7 = vector.load %arg6[%c0_5, %c0_6] : memref<2x768xf32, #tpu.memory_space<vmem>>, vector<2x768xf32>
    tpu.vector_store %arg6[%c0_5, %c0_6], %6 {strides = array<i32>} : memref<2x768xf32, #tpu.memory_space<vmem>>, vector<2x768xf32>,
    %c0_i32_7 = arith.constant 0 : i32
    %8 = arith.cmpi eq, %arg1, %c0_i32_7 : i32
    %9 = arith.extui %8 : i1 to i32
    %c0_i32_8 = arith.constant 0 : i32
    %10 = arith.cmpi ne, %9, %c0_i32_8 : i32
    scf.if %10 {
      %c0_9 = arith.constant 0 : index
      %c0_10 = arith.constant 0 : index
      %11 = vector.load %arg6[%c0_9, %c0_10] : memref<2x768xf32, #tpu.memory_space<vmem>>, vector<2x768xf32>
      %c0_11 = arith.constant 0 : index
      %c0_12 = arith.constant 0 : index
      %12 = vector.load %arg3[%c0_11, %c0_12] : memref<768x128xf32, #tpu.memory_space<vmem>>, vector<768x128xf32>
      %cst_13 = arith.constant dense<0.000000e+00> : vector<2x128xf32>
      %13 = tpu.matmul %11, %12, %cst_13 {dimension_numbers = #tpu.dot_dimension_numbers<[1], [0], [0], [1], [0, 0, 1, 1], [], []>} : vector<2x768xf32>, vector<768x128xf32>, vector<2x128xf32> -> vector<2x128xf32>
      %c0_14 = arith.constant 0 : index
      %c0_15 = arith.constant 0 : index
      %14 = vector.load %arg4[%c0_14, %c0_15] : memref<1x128xf32, #tpu.memory_space<vmem>>, vector<1x128xf32>
      %15 = vector.broadcast %14 : vector<1x128xf32> to vector<2x128xf32>
      %16 = arith.addf %13, %15 : vector<2x128xf32>
      %c0_16 = arith.constant 0 : index
      %c0_17 = arith.constant 0 : index
      %17 = vector.load %arg5[%c0_16, %c0_17] : memref<2x128xf32, #tpu.memory_space<vmem>>, vector<2x128xf32>
      tpu.vector_store %arg5[%c0_16, %c0_17], %16 {strides = array<i32>} : memref<2x128xf32, #tpu.memory_space<vmem>>, vector<2x128xf32>,
    } else {
    }
    return
  }
  func.func @transform_0(%arg0: i32, %arg1: i32) -> (i32, i32, i32) {
    %c0_i32 = arith.constant 0 : i32
    %c0_i32_0 = arith.constant 0 : i32
    return %arg0, %arg1, %c0_i32 : i32, i32, i32
  }
  func.func @transform_1(%arg0: i32, %arg1: i32) -> (i32, i32) {
    %c0_i32 = arith.constant 0 : i32
    %c0_i32_0 = arith.constant 0 : i32
    %c0_i32_1 = arith.constant 0 : i32
    return %c0_i32, %c0_i32_0 : i32, i32
  }
  func.func @transform_2(%arg0: i32, %arg1: i32) -> (i32, i32) {
    %c0_i32 = arith.constant 0 : i32
    %c0_i32_0 = arith.constant 0 : i32
    %c0_i32_1 = arith.constant 0 : i32
    return %c0_i32, %c0_i32_0 : i32, i32
  }
  func.func @transform_3(%arg0: i32, %arg1: i32) -> (i32, i32) {
    %c0_i32 = arith.constant 0 : i32
    %c0_i32_0 = arith.constant 0 : i32
    return %arg0, %c0_i32 : i32, i32
  }
}

</mosaic_0001>

<bundles_post_ra>
// kernel: tpu_custom_call.1
= control target key start
LH: loop header
LB: loop body
LE: loop exit
PB: predicated region body
PF: predicated region fallthrough
CT: control target
= control target key end

     0   :  { %8 = vsyncpa [#allocation4], 0  ;;  %s600_s0 = inlined_call_operand.hbm [shape: f32[2,8,768], index: 0, kind: input, shape index: {}]   ;;  %s601_s1 = inlined_call_operand.hbm [shape: f32[768,128], index: 1, kind: input, shape index: {}]   ;;  %s602_s2 = inlined_call_operand.vmem [shape: f32[1,128], index: 2, kind: input, shape index: {}]   ;;  %s603_s3 = inlined_call_operand.hbm [shape: f32[2,128], index: 3, kind: output, shape index: {}]  }
   0x1   :  { %9 = vsyncpa [#allocation7], 0 }
   0x2   :  { %10 = vsyncpa [#allocation5], 0  ;;  %s15_s14 = sshll.u32 %s600_s0, 4  ;;  %s544_s15 = smov [#allocation3]   ;;  %s16_s14 = int_to_ptr.hbm [resolvable:$true] %s15_s14 }
   0x3   :  { %s17_s16 = sshll.u32 %s544_s15, 4  ;;  %s28_s19 = sshll.u32 %s601_s1, 4  ;;  %s18_s16 = int_to_ptr.vmem [resolvable:$true] %s17_s16  ;;  %s29_s19 = int_to_ptr.hbm [resolvable:$true] %s28_s19 }
   0x4   :  { %s545_s20 = smov 768   ;;  %s546_s21 = smov 48  }
   0x5   :  { %23 = dma.hbm_to_vmem [thread:$0]  %s16_s14, 1536, %s18_s16, [#allocation4], %s545_s20, %s545_s20, %s546_s21  }
   0x6   :  { %s547_s22 = smov [#allocation6]   ;;  %s548_s24 = smov 128  }
   0x7   :  { %s30_s23 = sshll.u32 %s547_s22, 4  ;;  %s549_s25 = smov 8   ;;  %s31_s23 = int_to_ptr.vmem [resolvable:$true] %s30_s23 }
   0x8   :  { %36 = dma.hbm_to_vmem [thread:$0]  %s29_s19, 12288, %s31_s23, [#allocation7], %s548_s24, %s548_s24, %s549_s25  }
   0x9   :  { %538 = dma.done.wait [#allocation4], 1536  }
   0xa   :  { %539 = vsyncadd [#allocation4], 4294965760 }
   0xb   :  { %540 = dma.done.wait [#allocation7], 12288  }
   0xc   :  { %541 = vsyncadd [#allocation7], 4294955008  ;;  %v216_v0 = vld [vmem:[#allocation6 + $0x78] sm:$0xff]  ;;  %v215_v1 = vld [vmem:[#allocation6 + $0x70] sm:$0xff]  ;;  %v550_v8 = vmov -inf   ;;  %vm159_vm0 = vcmask 1041408  }
   0xd   :  { %v232_v2 = vld [vmem:[#allocation6 + $0xf8] sm:$0xff]  ;;  %318 = vmatpush.msra.mxu0 %v216_v0  ;;  %v231_v3 = vld [vmem:[#allocation6 + $0xf0] sm:$0xff]  ;;  %v214_v4 = vld [vmem:[#allocation6 + $0x68] sm:$0xff]  ;;  %52 = vst [vmem:[#allocation2 + $0x8] sm:$0xf] %v550_v8  ;;  %vm161_vm1 = vcmask 1045508  }
   0xe   :  { %338 = vmatpush.msra.mxu1 %v232_v2  ;;  %v230_v5 = vld [vmem:[#allocation6 + $0xe8] sm:$0xff]  ;;  %v213_v6 = vld [vmem:[#allocation6 + $0x60] sm:$0xff]  ;;  %v212_v9 = vld [vmem:[#allocation6 + $0x58] sm:$0xff]  ;;  %vm163_vm2 = vcmask 1043456   ;;  %vm175_vm3 = vcmask 1041409   ;;  %vm177_vm4 = vcmask 1043459  }
   0xf   :  { %319 = vmatpush.msra.mxu0 %v215_v1  ;;  %v229_v7 = vld [vmem:[#allocation6 + $0xe0] sm:$0xff]  ;;  %v228_v10 = vld [vmem:[#allocation6 + $0xd8] sm:$0xff]  ;;  %v211_v11 = vld [vmem:[#allocation6 + $0x50] sm:$0xff]  ;;  %vm179_vm5 = vcmask 1045509   ;;  %vm181_vm6 = vcmask 1047559   ;;  %s551_s26 = smov [#allocation8]  }
  0x10   :  { %339 = vmatpush.msra.mxu1 %v231_v3  ;;  %v248_v12 = vld [vmem:[#allocation6 + $0x178] sm:$0xff]  ;;  %v227_v13 = vld [vmem:[#allocation6 + $0xd0] sm:$0xff]  ;;  %v246_v16 = vld [vmem:[#allocation6 + $0x168] sm:$0xff]  ;;  %s444_s27 = sshll.u32 %s551_s26, 4  ;;  %s446_s30 = sshll.u32 %s603_s3, 4  ;;  %s445_s27 = int_to_ptr.vmem [resolvable:$true] %s444_s27  ;;  %s447_s30 = int_to_ptr.hbm [resolvable:$true] %s446_s30 }
  0x11   :  { %320 = vmatpush.msra.mxu0 %v214_v4  ;;  %358 = vmatpush.msra.mxu2 %v248_v12  ;;  %v247_v14 = vld [vmem:[#allocation6 + $0x170] sm:$0xff]  ;;  %v264_v15 = vld [vmem:[#allocation6 + $0x1f8] sm:$0xff]  ;;  %v210_v18 = vld [vmem:[#allocation6 + $0x48] sm:$0xff] }
  0x12   :  { %340 = vmatpush.msra.mxu1 %v230_v5  ;;  %v263_v17 = vld [vmem:[#allocation6 + $0x1f0] sm:$0xff]  ;;  %v226_v19 = vld [vmem:[#allocation6 + $0xc8] sm:$0xff]  ;;  %378 = vmatpush.msra.mxu3 %v264_v15  ;;  %v245_v20 = vld [vmem:[#allocation6 + $0x160] sm:$0xff] }
  0x13   :  { %321 = vmatpush.msra.mxu0 %v213_v6  ;;  %359 = vmatpush.msra.mxu2 %v247_v14  ;;  %v262_v21 = vld [vmem:[#allocation6 + $0x1e8] sm:$0xff]  ;;  %v209_v22 = vld [vmem:[#allocation6 + $0x40] sm:$0xff]  ;;  %v244_v24 = vld [vmem:[#allocation6 + $0x158] sm:$0xff] }
  0x14   :  { %341 = vmatpush.msra.mxu1 %v229_v7  ;;  %v225_v23 = vld [vmem:[#allocation6 + $0xc0] sm:$0xff]  ;;  %379 = vmatpush.msra.mxu3 %v263_v17  ;;  %v208_v26 = vld [vmem:[#allocation6 + $0x38] sm:$0xff]  ;;  %v243_v28 = vld [vmem:[#allocation6 + $0x150] sm:$0xff] }
  0x15   :  { %322 = vmatpush.msra.mxu0 %v212_v9  ;;  %360 = vmatpush.msra.mxu2 %v246_v16  ;;  %v261_v25 = vld [vmem:[#allocation6 + $0x1e0] sm:$0xff]  ;;  %v224_v27 = vld [vmem:[#allocation6 + $0xb8] sm:$0xff]  ;;  %v207_v30 = vld [vmem:[#allocation6 + $0x30] sm:$0xff] }
  0x16   :  { %342 = vmatpush.msra.mxu1 %v228_v10  ;;  %380 = vmatpush.msra.mxu3 %v262_v21  ;;  %v260_v29 = vld [vmem:[#allocation6 + $0x1d8] sm:$0xff]  ;;  %v223_v31 = vld [vmem:[#allocation6 + $0xb0] sm:$0xff]  ;;  %v242_v32 = vld [vmem:[#allocation6 + $0x148] sm:$0xff] }
  0x17   :  { %323 = vmatpush.msra.mxu0 %v211_v11  ;;  %361 = vmatpush.msra.mxu2 %v245_v20  ;;  %v259_v33 = vld [vmem:[#allocation6 + $0x1d0] sm:$0xff]  ;;  %v206_v34 = vld [vmem:[#allocation6 + $0x28] sm:$0xff]  ;;  %v241_v36 = vld [vmem:[#allocation6 + $0x140] sm:$0xff] }
  0x18   :  { %343 = vmatpush.msra.mxu1 %v227_v13  ;;  %381 = vmatpush.msra.mxu3 %v261_v25  ;;  %v222_v35 = vld [vmem:[#allocation6 + $0xa8] sm:$0xff]  ;;  %v205_v38 = vld [vmem:[#allocation6 + $0x20] sm:$0xff]  ;;  %v240_v40 = vld [vmem:[#allocation6 + $0x138] sm:$0xff] }
  0x19   :  { %324 = vmatpush.msra.mxu0 %v210_v18  ;;  %362 = vmatpush.msra.mxu2 %v244_v24  ;;  %v258_v37 = vld [vmem:[#allocation6 + $0x1c8] sm:$0xff]  ;;  %v221_v39 = vld [vmem:[#allocation6 + $0xa0] sm:$0xff]  ;;  %v204_v42 = vld [vmem:[#allocation6 + $0x18] sm:$0xff] }
  0x1a   :  { %344 = vmatpush.msra.mxu1 %v226_v19  ;;  %382 = vmatpush.msra.mxu3 %v260_v29  ;;  %v257_v41 = vld [vmem:[#allocation6 + $0x1c0] sm:$0xff]  ;;  %v220_v43 = vld [vmem:[#allocation6 + $0x98] sm:$0xff]  ;;  %v239_v44 = vld [vmem:[#allocation6 + $0x130] sm:$0xff] }
  0x1b   :  { %325 = vmatpush.msra.mxu0 %v209_v22  ;;  %363 = vmatpush.msra.mxu2 %v243_v28  ;;  %v256_v45 = vld [vmem:[#allocation6 + $0x1b8] sm:$0xff]  ;;  %v203_v46 = vld [vmem:[#allocation6 + $0x10] sm:$0xff]  ;;  %v202_v48 = vld [vmem:[#allocation6 + $0x8] sm:$0xff] }
  0x1c   :  { %345 = vmatpush.msra.mxu1 %v225_v23  ;;  %383 = vmatpush.msra.mxu3 %v259_v33  ;;  %v219_v47 = vld [vmem:[#allocation6 + $0x90] sm:$0xff]  ;;  %v238_v49 = vld [vmem:[#allocation6 + $0x128] sm:$0xff]  ;;  %v201_v51 = vld [vmem:[#allocation6] sm:$0xff] }
  0x1d   :  { %326 = vmatpush.msra.mxu0 %v208_v26  ;;  %364 = vmatpush.msra.mxu2 %v242_v32  ;;  %v255_v50 = vld [vmem:[#allocation6 + $0x1b0] sm:$0xff]  ;;  %v218_v52 = vld [vmem:[#allocation6 + $0x88] sm:$0xff]  ;;  %v217_v53 = vld [vmem:[#allocation6 + $0x80] sm:$0xff] }
  0x1e   :  { %346 = vmatpush.msra.mxu1 %v224_v27  ;;  %384 = vmatpush.msra.mxu3 %v258_v37  ;;  %v280_v54 = vld [vmem:[#allocation6 + $0x278] sm:$0xff]  ;;  %v237_v56 = vld [vmem:[#allocation6 + $0x120] sm:$0xff]  ;;  %v254_v57 = vld [vmem:[#allocation6 + $0x1a8] sm:$0xff] }
  0x1f   :  { %327 = vmatpush.msra.mxu0 %v207_v30  ;;  %365 = vmatpush.msra.mxu2 %v241_v36  ;;  %v296_v55 = vld [vmem:[#allocation6 + $0x2f8] sm:$0xff]  ;;  %v53_v59 = vld [vmem:[#allocation3] sm:$0xff]  ;;  %v54_v60 = vld [vmem:[#allocation3 + $0x8] sm:$0xff] }
  0x20   :  { %347 = vmatpush.msra.mxu1 %v223_v31  ;;  %385 = vmatpush.msra.mxu3 %v257_v41  ;;  %v236_v58 = vld [vmem:[#allocation6 + $0x118] sm:$0xff]  ;;  %v55_v61 = vld [vmem:[#allocation3 + $0x10] sm:$0xff]  ;;  %v65_v1 = vrot.slane %v53_v59, 4  ;;  %v71_v2 = vrot.slane %v54_v60, 4  ;;  %v253_v4 = vld [vmem:[#allocation6 + $0x1a0] sm:$0xff] }
  0x21   :  { %328 = vmatpush.msra.mxu0 %v206_v34  ;;  %366 = vmatpush.msra.mxu2 %v240_v40  ;;  %v56_v62 = vld [vmem:[#allocation3 + $0x18] sm:$0xff]  ;;  %v59_v63 = vld [vmem:[#allocation3 + $0x30] sm:$0xff]  ;;  %v77_v3 = vrot.slane %v55_v61, 4  ;;  %v61_v5 = vld [vmem:[#allocation3 + $0x40] sm:$0xff] }
  0x22   :  { %348 = vmatpush.msra.mxu1 %v222_v35  ;;  %386 = vmatpush.msra.mxu3 %v256_v45  ;;  %v60_v0 = vld [vmem:[#allocation3 + $0x38] sm:$0xff]  ;;  %v62_v6 = vld [vmem:[#allocation3 + $0x48] sm:$0xff]  ;;  %v83_v7 = vrot.slane %v56_v62, 4  ;;  %v101_v8 = vrot.slane %v59_v63, 4  ;;  %v279_v10 = vld [vmem:[#allocation6 + $0x270] sm:$0xff]  ;;  %v66_v12 = vmax.f32 %v53_v59, %v65_v1  ;;  %v72_v13 = vmax.f32 %v54_v60, %v71_v2 }
  0x23   :  { %329 = vmatpush.msra.mxu0 %v205_v38  ;;  %367 = vmatpush.msra.mxu2 %v239_v44  ;;  %v107_v9 = vrot.slane %v60_v0, 4  ;;  %v295_v11 = vld [vmem:[#allocation6 + $0x2f0] sm:$0xff]  ;;  %v78_v14 = vmax.f32 %v55_v61, %v77_v3  ;;  %v113_v15 = vrot.slane %v61_v5, 4  ;;  %v252_v17 = vld [vmem:[#allocation6 + $0x198] sm:$0xff]  ;;  %v119_v21 = vrot.slane %v62_v6, 4  ;;  %v278_v22 = vld [vmem:[#allocation6 + $0x268] sm:$0xff] }
  0x24   :  { %349 = vmatpush.msra.mxu1 %v221_v39  ;;  %387 = vmatpush.msra.mxu3 %v255_v50  ;;  %v235_v16 = vld [vmem:[#allocation6 + $0x110] sm:$0xff]  ;;  %v84_v18 = vmax.f32 %v56_v62, %v83_v7  ;;  %v102_v19 = vmax.f32 %v59_v63, %v101_v8  ;;  %v294_v23 = vld [vmem:[#allocation6 + $0x2e8] sm:$0xff]  ;;  %v67_v24 = vrot.slane %v66_v12, 2  ;;  %v73_v25 = vrot.slane %v72_v13, 2  ;;  %v277_v34 = vld [vmem:[#allocation6 + $0x260] sm:$0xff] }
  0x25   :  { %330 = vmatpush.msra.mxu0 %v204_v42  ;;  %368 = vmatpush.msra.mxu2 %v238_v49  ;;  %v108_v20 = vmax.f32 %v60_v0, %v107_v9  ;;  %v79_v26 = vrot.slane %v78_v14, 2  ;;  %v114_v27 = vmax.f32 %v61_v5, %v113_v15  ;;  %v234_v28 = vld [vmem:[#allocation6 + $0x108] sm:$0xff]  ;;  %v251_v29 = vld [vmem:[#allocation6 + $0x190] sm:$0xff]  ;;  %v120_v33 = vmax.f32 %v62_v6, %v119_v21  ;;  %v293_v35 = vld [vmem:[#allocation6 + $0x2e0] sm:$0xff] }
  0x26   :  { %350 = vmatpush.msra.mxu1 %v220_v43  ;;  %388 = vmatpush.msra.mxu3 %v254_v57  ;;  %v85_v30 = vrot.slane %v84_v18, 2  ;;  %v103_v31 = vrot.slane %v102_v19, 2  ;;  %v68_v36 = vmax.f32 %v66_v12, %v67_v24  ;;  %v74_v37 = vmax.f32 %v72_v13, %v73_v25  ;;  %v233_v40 = vld [vmem:[#allocation6 + $0x100] sm:$0xff]  ;;  %v250_v41 = vld [vmem:[#allocation6 + $0x188] sm:$0xff]  ;;  %v291_v59 = vld [vmem:[#allocation6 + $0x2d0] sm:$0xff] }
  0x27   :  { %331 = vmatpush.msra.mxu0 %v203_v46  ;;  %369 = vmatpush.msra.mxu2 %v237_v56  ;;  %v109_v32 = vrot.slane %v108_v20, 2  ;;  %v80_v38 = vmax.f32 %v78_v14, %v79_v26  ;;  %v115_v39 = vrot.slane %v114_v27, 2  ;;  %v121_v45 = vrot.slane %v120_v33, 2  ;;  %v276_v46 = vld [vmem:[#allocation6 + $0x258] sm:$0xff]  ;;  %v249_v56 = vld [vmem:[#allocation6 + $0x180] sm:$0xff]  ;;  %v58_v0 = vld [vmem:[#allocation3 + $0x28] sm:$0xff] }
  0x28   :  { %351 = vmatpush.msra.mxu1 %v219_v47  ;;  %389 = vmatpush.msra.mxu3 %v253_v4  ;;  %v86_v42 = vmax.f32 %v84_v18, %v85_v30  ;;  %v104_v43 = vmax.f32 %v102_v19, %v103_v31  ;;  %v292_v47 = vld [vmem:[#allocation6 + $0x2d8] sm:$0xff]  ;;  %v75_v49 = vrot.slane %v74_v37, 1  ;;  %v57_v57 = vld [vmem:[#allocation3 + $0x20] sm:$0xff]  ;;  %v63_v5 = vld [vmem:[#allocation3 + $0x50] sm:$0xff] }
  0x29   :  { %332 = vmatpush.msra.mxu0 %v202_v48  ;;  %370 = vmatpush.msra.mxu2 %v236_v58  ;;  %v110_v44 = vmax.f32 %v108_v20, %v109_v32  ;;  %v69_v48 = vrot.slane %v68_v36, 1  ;;  %v81_v50 = vrot.slane %v80_v38, 1  ;;  %v275_v58 = vld [vmem:[#allocation6 + $0x250] sm:$0xff]  ;;  %v274_v6 = vld [vmem:[#allocation6 + $0x248] sm:$0xff]  ;;  %v64_v15 = vld [vmem:[#allocation3 + $0x58] sm:$0xff] }
  0x2a   :  { %352 = vmatpush.msra.mxu1 %v218_v52  ;;  %390 = vmatpush.msra.mxu3 %v252_v17  ;;  %v87_v52 = vrot.slane %v86_v42, 1  ;;  %v76_v61 = vmax.f32 %v74_v37, %v75_v49  ;;  %v290_v7 = vld [vmem:[#allocation6 + $0x2c8] sm:$0xff]  ;;  %v273_v17 = vld [vmem:[#allocation6 + $0x240] sm:$0xff]  ;;  %v131_v31 = vrot.slane %v64_v15, 4 }
  0x2b   :  { %333 = vmatpush.msra.mxu0 %v201_v51  ;;  %371 = vmatpush.msra.mxu2 %v235_v16  ;;  %v116_v51 = vmax.f32 %v114_v27, %v115_v39  ;;  %v70_v60 = vmax.f32 %v68_v36, %v69_v48  ;;  %v82_v62 = vmax.f32 %v80_v38, %v81_v50  ;;  %v95_v16 = vrot.slane %v58_v0, 4  ;;  %v289_v18 = vld [vmem:[#allocation6 + $0x2c0] sm:$0xff]  ;;  %v272_v27 = vld [vmem:[#allocation6 + $0x238] sm:$0xff]  ;;  %v287_v36 = vld [vmem:[#allocation6 + $0x2b0] sm:$0xff] }
  0x2c   :  { %353 = vmatpush.msra.mxu1 %v217_v53  ;;  %391 = vmatpush.msra.mxu3 %v251_v29  ;;  %v105_v53 = vrot.slane %v104_v43, 1  ;;  %v88_v1 = vmax.f32 %v86_v42, %v87_v52  ;;  %v151_v9 = vrot.slane %v76_v61, 6  ;;  %v269_v50 = vld [vmem:[#allocation6 + $0x220] sm:$0xff]  ;;  %v267_v61 = vld [vmem:[#allocation6 + $0x210] sm:$0xff] }
  0x2d   :  { %398 = vmatpush.msrb.mxu0 %v280_v54  ;;  %372 = vmatpush.msra.mxu2 %v234_v28  ;;  %v111_v54 = vrot.slane %v110_v44, 1  ;;  %v117_v63 = vrot.slane %v116_v51, 1  ;;  %v96_v26 = vmax.f32 %v58_v0, %v95_v16  ;;  %v288_v28 = vld [vmem:[#allocation6 + $0x2b8] sm:$0xff] }
  0x2e   :  { %418 = vmatpush.msrb.mxu1 %v296_v55  ;;  %v122_v55 = vmax.f32 %v120_v33, %v121_v45  ;;  %392 = vmatpush.msra.mxu3 %v250_v41  ;;  %v106_v2 = vmax.f32 %v104_v43, %v105_v53  ;;  %v153_v13 = vrot.slane %v88_v1, 2  ;;  %v160_v20 = vsel %vm159_vm0, %v70_v60, %v151_v9  ;;  %v270_v43 = vld [vmem:[#allocation6 + $0x228] sm:$0xff]  ;;  %v281_v9 = vld [vmem:[#allocation6 + $0x280] sm:$0xff] }
  0x2f   :  { %399 = vmatpush.msrb.mxu0 %v279_v10  ;;  %373 = vmatpush.msra.mxu2 %v233_v40  ;;  %v112_v3 = vmax.f32 %v110_v44, %v111_v54  ;;  %v118_v8 = vmax.f32 %v116_v51, %v117_v63  ;;  %v152_v10 = vrot.slane %v82_v62, 4  ;;  %v132_v40 = vmax.f32 %v64_v15, %v131_v31  ;;  %v286_v44 = vld [vmem:[#allocation6 + $0x2a8] sm:$0xff]  ;;  %v285_v51 = vld [vmem:[#allocation6 + $0x2a0] sm:$0xff]  ;;  %v283_v62 = vld [vmem:[#allocation6 + $0x290] sm:$0xff] }
  0x30   :  { %419 = vmatpush.msrb.mxu1 %v295_v11  ;;  %v123_v4 = vrot.slane %v122_v55, 1  ;;  %393 = vmatpush.msra.mxu3 %v249_v56  ;;  %v89_v11 = vrot.slane %v57_v57, 4 }
  0x31   :  { %400 = vmatpush.msrb.mxu0 %v278_v22  ;;  %v155_v14 = vrot.slane %v112_v3, 6  ;;  %v156_v19 = vrot.slane %v118_v8, 4  ;;  %v125_v22 = vrot.slane %v63_v5, 4  ;;  %v162_v24 = vsel %vm161_vm1, %v152_v10, %v153_v13  ;;  %v266_v3 = vld [vmem:[#allocation6 + $0x208] sm:$0xff] }
  0x32   :  { %420 = vmatpush.msrb.mxu1 %v294_v23  ;;  %v124_v12 = vmax.f32 %v122_v55, %v123_v4  ;;  %v90_v21 = vmax.f32 %v57_v57, %v89_v11  ;;  %v164_v32 = vsel %vm163_vm2, %v160_v20, %v162_v24  ;;  %v282_v4 = vld [vmem:[#allocation6 + $0x288] sm:$0xff] }
  0x33   :  { %401 = vmatpush.msrb.mxu0 %v277_v34  ;;  %v166_v25 = vsel %vm159_vm0, %v106_v2, %v155_v14  ;;  %v126_v30 = vmax.f32 %v63_v5, %v125_v22  ;;  %v97_v34 = vrot.slane %v96_v26, 2  ;;  %v465_v24 = vld [vmem:[%s602_s2] ss:$0 sm:$0xff] }
  0x34   :  { %421 = vmatpush.msrb.mxu1 %v293_v35  ;;  %v157_v23 = vrot.slane %v124_v12, 2  ;;  %v91_v29 = vrot.slane %v90_v21, 2  ;;  %v271_v35 = vld [vmem:[#allocation6 + $0x230] sm:$0xff]  ;;  %v138_v12 = vld [vmem:[#allocation2 + $0x8] sm:$0xf] }
  0x35   :  { %402 = vmatpush.msrb.mxu0 %v276_v46  ;;  %v127_v39 = vrot.slane %v126_v30, 2  ;;  %v98_v42 = vmax.f32 %v96_v26, %v97_v34  ;;  %v133_v46 = vrot.slane %v132_v40, 2 }
  0x36   :  { %422 = vmatpush.msrb.mxu1 %v292_v47  ;;  %v167_v33 = vsel %vm161_vm1, %v156_v19, %v157_v23  ;;  %v92_v38 = vmax.f32 %v90_v21, %v91_v29 }
  0x37   :  { %403 = vmatpush.msrb.mxu0 %v275_v58  ;;  %v168_v37 = vsel %vm163_vm2, %v166_v25, %v167_v33  ;;  %v128_v45 = vmax.f32 %v126_v30, %v127_v39  ;;  %v99_v48 = vrot.slane %v98_v42, 1  ;;  %v134_v54 = vmax.f32 %v132_v40, %v133_v46  ;;  %v268_v58 = vld [vmem:[#allocation6 + $0x218] sm:$0xff] }
  0x38   :  { %423 = vmatpush.msrb.mxu1 %v291_v59  ;;  %v174_v41 = vrot.slane %v168_v37, 7  ;;  %v93_v52 = vrot.slane %v92_v38, 1  ;;  %v284_v59 = vld [vmem:[#allocation6 + $0x298] sm:$0xff] }
  0x39   :  { %404 = vmatpush.msrb.mxu0 %v274_v6  ;;  %v129_v53 = vrot.slane %v128_v45, 1  ;;  %v100_v56 = vmax.f32 %v98_v42, %v99_v48  ;;  %v135_v60 = vrot.slane %v134_v54, 1  ;;  %v265_v6 = vld [vmem:[#allocation6 + $0x200] sm:$0xff] }
  0x3a   :  { %424 = vmatpush.msrb.mxu1 %v290_v7  ;;  %v176_v47 = vsel %vm175_vm3, %v174_v41, %v164_v32  ;;  %v94_v63 = vmax.f32 %v92_v38, %v93_v52 }
  0x3b   :  { %405 = vmatpush.msrb.mxu0 %v273_v17  ;;  %v178_v49 = vsel %vm177_vm4, %v174_v41, %v176_v47  ;;  %v130_v0 = vmax.f32 %v128_v45, %v129_v53  ;;  %v136_v1 = vmax.f32 %v134_v54, %v135_v60  ;;  %v154_v2 = vrot.slane %v100_v56, 6 }
  0x3c   :  { %425 = vmatpush.msrb.mxu1 %v289_v18  ;;  %v180_v55 = vsel %vm179_vm5, %v174_v41, %v178_v49 }
  0x3d   :  { %406 = vmatpush.msrb.mxu0 %v272_v27  ;;  %v182_v57 = vsel %vm181_vm6, %v174_v41, %v180_v55  ;;  %v158_v5 = vrot.slane %v136_v1, 6  ;;  %v165_v7 = vsel %vm159_vm0, %v94_v63, %v154_v2 }
  0x3e   :  { %426 = vmatpush.msrb.mxu1 %v288_v28  ;;  %303 = vst [vmem:[#allocation1] ss:$4 sm:$0xff] %v182_v57 }
  0x3f   :  { %407 = vmatpush.msrb.mxu0 %v271_v35  ;;  %v169_v8 = vsel %vm159_vm0, %v130_v0, %v158_v5 }
  0x40   :  { %427 = vmatpush.msrb.mxu1 %v287_v36  ;;  %v185_v10 = vrot.slane %v169_v8, 7 }
  0x41   :  { %408 = vmatpush.msrb.mxu0 %v270_v43 }
  0x42   :  { %428 = vmatpush.msrb.mxu1 %v286_v44  ;;  %v186_v11 = vsel %vm175_vm3, %v185_v10, %v165_v7 }
  0x43   :  { %409 = vmatpush.msrb.mxu0 %v269_v50  ;;  %v187_v13 = vsel %vm177_vm4, %v185_v10, %v186_v11 }
  0x44   :  { %429 = vmatpush.msrb.mxu1 %v285_v51  ;;  %v188_v16 = vsel %vm179_vm5, %v185_v10, %v187_v13 }
  0x45   :  { %410 = vmatpush.msrb.mxu0 %v268_v58  ;;  %v308_v14 = vld.sshfl [vmem:[#allocation1 + $0x10] sm:$0xff pattern:$0x73625140]  ;;  %v306_v15 = vld.sshfl [vmem:[#allocation1] sm:$0xff pattern:$0x73625140]  ;;  %v189_v19 = vsel %vm181_vm6, %v185_v10, %v188_v16 }
  0x46   :  { %430 = vmatpush.msrb.mxu1 %v284_v59  ;;  %374 = vmatmul.f32.vlgmr.msra.gmra.mxu2 %v308_v14  ;;  %v309_v17 = vld.sshfl [vmem:[#allocation1 + $0x18] sm:$0xff pattern:$0x73625140]  ;;  %v307_v18 = vld.sshfl [vmem:[#allocation1 + $0x8] sm:$0xff pattern:$0x73625140]  ;;  %v193_v20 = vmax.f32 %v138_v12, %v189_v19 }
  0x47   :  { %411 = vmatpush.msrb.mxu0 %v267_v61  ;;  %394 = vmatmul.f32.vlgmr.msra.gmra.mxu3 %v309_v17 }
  0x48   :  { %431 = vmatpush.msrb.mxu1 %v283_v62  ;;  %334 = vmatmul.f32.vlgmr.msra.gmra.mxu0 %v306_v15  ;;  %195 = vst [vmem:[#allocation2 + $0x8] sm:$0xf] %v193_v20 }
  0x49   :  { %412 = vmatpush.msrb.mxu0 %v266_v3  ;;  %354 = vmatmul.f32.vlgmr.msra.gmra.mxu1 %v307_v18 }
  0x4a   :  { %432 = vmatpush.msrb.mxu1 %v282_v4 }
  0x4b   :  { %413 = vmatpush.msrb.mxu0 %v265_v6 }
  0x4c   :  { %433 = vmatpush.msrb.mxu1 %v281_v9 }
  0x4f   :  { %v200_v21 = vld [vmem:[#allocation2 + $0x8] sm:$0xf] }
  0x50   :  { %305 = vst [vmem:[#allocation1 + $0x20] ss:$4 sm:$0xff] %v200_v21 }
  0x57   :  { %v310_v22 = vld.sshfl [vmem:[#allocation1 + $0x20] sm:$0xff pattern:$0x73625140]  ;;  %v311_v23 = vld.sshfl [vmem:[#allocation1 + $0x28] sm:$0xff pattern:$0x73625140] }
  0x58   :  { %414 = vmatmul.f32.vlgmr.msrb.gmra.mxu0 %v310_v22  ;;  %434 = vmatmul.f32.vlgmr.msrb.gmra.mxu1 %v311_v23 }
  0xc5   :  { %v335_v25 = vpop.f32.mrf.mxu0 }
  0xc6   :  { %v336_v26 = vadd.f32 %v465_v24, %v335_v25  ;;  %v355_v27 = vpop.f32.mrf.mxu1 }
  0xc8   :  { %v356_v28 = vadd.f32 %v355_v27, %v336_v26 }
  0xc9   :  { %v375_v29 = vpop.f32.mrf.mxu2 }
  0xca   :  { %v376_v30 = vadd.f32 %v375_v29, %v356_v28  ;;  %v395_v31 = vpop.f32.mrf.mxu3 }
  0xcc   :  { %v396_v32 = vadd.f32 %v395_v31, %v376_v30 }
  0xd5   :  { %v415_v33 = vpop.f32.mrf.mxu0  ;;  %v435_v34 = vpop.f32.mrf.mxu1 }
  0xd6   :  { %v416_v35 = vadd.f32 %v415_v33, %v396_v32 }
  0xd8   :  { %v436_v36 = vadd.f32 %v435_v34, %v416_v35 }
  0xda   :  { %438 = vst [vmem:[#allocation8] sm:$0x3] %v436_v36 }
  0xdb   :  { %449 = dma.vmem_to_hbm [thread:$0]  %s445_s27, 32, %s447_s30, [#allocation5]  }
  0xdc   :  { %542 = dma.done.wait [#allocation5], 32  }
  0xdd   :  { %543 = vsyncadd [#allocation5], 4294967264 }
  0xde   :  { %454 = vsyncpa [#allocation4], 1 }
  0xdf   :  { %455 = vsyncpa [#allocation7], 1 }
  0xe0   :  { %456 = vsyncpa [#allocation5], 1 }

</bundles_post_ra>
